<compile_context>
chip_gen: v7x
topology: tpu7x:2x2x1
jax: 0.10.0
libtpu: 0.0.40
codegen_flags: <defaults>
</compile_context>

<pallas_src>
import functools

import jax
import jax.numpy as jnp
from jax.experimental import pallas as pl
from jax.experimental.pallas import tpu as pltpu


def _attention_kernel(q_ref, x_ref,
                      wq_ref, bq_ref,
                      wk_ref, bk_ref,
                      wv_ref, bv_ref,
                      out_ref, attn_ref,
                      *, scale, bblk, s_q, s_kv, d):
    # Block of `bblk` batch elements per grid step.
    q = q_ref[...]                              # (Bblk, S_q,  D), native dtype
    x = x_ref[...]                              # (Bblk, S_kv, D), native dtype

    # Merge (batch, seq) into one M dim so the projection matmuls are larger.
    q2 = q.reshape(bblk * s_q, d)
    x2 = x.reshape(bblk * s_kv, d)

    # Linear projections: y = x @ W_t + b.  Weights already (in, out) -> no .T.
    # MXU consumes the native dtype; accumulation is f32.
    queries = jnp.dot(q2, wq_ref[...], preferred_element_type=jnp.float32)
    queries = queries + bq_ref[...].astype(jnp.float32)
    keys = jnp.dot(x2, wk_ref[...], preferred_element_type=jnp.float32)
    keys = keys + bk_ref[...].astype(jnp.float32)
    values = jnp.dot(x2, wv_ref[...], preferred_element_type=jnp.float32)
    values = values + bv_ref[...].astype(jnp.float32)

    # Fold the 1/sqrt(D) scale into Q.
    queries = (queries * scale).reshape(bblk, s_q, d)
    keys = keys.reshape(bblk, s_kv, d)
    values = values.reshape(bblk, s_kv, d)

    # scores = Q @ K^T  -- contraction on the last dim of BOTH operands,
    # so no transpose is materialized.
    scores = jnp.einsum("bqd,bkd->bqk", queries, keys,
                        preferred_element_type=jnp.float32)

    # Softmax over the last axis (dim=2 in torch), f32 math throughout.
    m = jnp.max(scores, axis=-1, keepdims=True)
    p = jnp.exp(scores - m)
    denom = jnp.sum(p, axis=-1, keepdims=True)
    attn = p * pl.reciprocal(denom, approx=True)     # EUP reciprocal

    weighted = jnp.einsum("bqk,bkd->bqd", attn, values,
                          preferred_element_type=jnp.float32)

    attn_ref[...] = attn.astype(attn_ref.dtype)
    out_ref[...] = weighted.astype(out_ref.dtype)


def _pick_batch_block(B, cap=8):
    """Largest divisor of B that is <= cap (amortizes per-step overhead)."""
    for cand in range(min(B, cap), 0, -1):
        if B % cand == 0:
            return cand
    return 1


def attention_forward(x, q, params):
    """x: (B, S_kv, D), q: (B, S_q, D). Returns (weighted, attention.squeeze(1))."""
    B, S_kv, D = x.shape
    _, S_q, _ = q.shape

    # Pre-transpose weights (out, in) -> (in, out): free layout plumbing in XLA,
    # removes all in-kernel transposes.
    wq_t = jnp.transpose(params["wq"])
    wk_t = jnp.transpose(params["wk"])
    wv_t = jnp.transpose(params["wv"])
    bq2 = params["bq"].reshape(1, D)
    bk2 = params["bk"].reshape(1, D)
    bv2 = params["bv"].reshape(1, D)

    bblk = _pick_batch_block(B)
    grid = (B // bblk,)

    kernel = functools.partial(
        _attention_kernel,
        scale=1.0 / (D ** 0.5),
        bblk=bblk, s_q=S_q, s_kv=S_kv, d=D,
    )

    weight_spec = pl.BlockSpec((D, D), lambda b: (0, 0))
    bias_spec = pl.BlockSpec((1, D), lambda b: (0, 0))

    itemsize = jnp.dtype(x.dtype).itemsize
    cost = pl.CostEstimate(
        flops=2 * B * (S_q * D * D + 2 * S_kv * D * D + 2 * S_q * S_kv * D),
        transcendentals=B * S_q * S_kv,
        bytes_accessed=(B * S_q * D + B * S_kv * D           # q, x
                        + 3 * D * D + 3 * D                  # weights, biases
                        + B * S_q * D + B * S_q * S_kv) * itemsize,
    )

    weighted, attn = pl.pallas_call(
        kernel,
        out_shape=(
            jax.ShapeDtypeStruct((B, S_q, D), x.dtype),
            jax.ShapeDtypeStruct((B, S_q, S_kv), x.dtype),
        ),
        grid_spec=pltpu.PrefetchScalarGridSpec(
            num_scalar_prefetch=0,
            grid=grid,
            in_specs=[
                pl.BlockSpec((bblk, S_q, D), lambda b: (b, 0, 0)),   # q
                pl.BlockSpec((bblk, S_kv, D), lambda b: (b, 0, 0)),  # x
                weight_spec, bias_spec,                               # query linear
                weight_spec, bias_spec,                               # key linear
                weight_spec, bias_spec,                               # value linear
            ],
            out_specs=[
                pl.BlockSpec((bblk, S_q, D), lambda b: (b, 0, 0)),
                pl.BlockSpec((bblk, S_q, S_kv), lambda b: (b, 0, 0)),
            ],
        ),
        compiler_params=pltpu.CompilerParams(
            dimension_semantics=("parallel",)),
        cost_estimate=cost,
    )(q, x, wq_t, bq2, wk_t, bk2, wv_t, bv2)

    # torch's .squeeze(1) only removes the axis if it has size 1
    attn_out = jnp.squeeze(attn, axis=1) if S_q == 1 else attn
    return weighted, attn_out


def init_params(key, input_dim, dtype=jnp.float32):
    """Deterministic init matching nn.Linear(input_dim, input_dim) shapes."""
    keys = jax.random.split(key, 6)
    bound = 1.0 / (input_dim ** 0.5)

    def u(k, shape):
        return jax.random.uniform(k, shape, dtype, minval=-bound, maxval=bound)

    return {
        "wq": u(keys[0], (input_dim, input_dim)), "bq": u(keys[1], (input_dim,)),
        "wk": u(keys[2], (input_dim, input_dim)), "bk": u(keys[3], (input_dim,)),
        "wv": u(keys[4], (input_dim, input_dim)), "bv": u(keys[5], (input_dim,)),
    }


def attention_reference(x, q, params):
    """Pure-JAX reference mirroring the PyTorch forward (weights are (out, in))."""
    D = x.shape[-1]
    queries = jnp.einsum("bsd,od->bso", q, params["wq"]) + params["bq"]
    keys = jnp.einsum("bsd,od->bso", x, params["wk"]) + params["bk"]
    values = jnp.einsum("bsd,od->bso", x, params["wv"]) + params["bv"]
    scores = jnp.einsum("bqd,bkd->bqk", queries, keys) / (D ** 0.5)
    attn = jax.nn.softmax(scores, axis=2)
    weighted = jnp.einsum("bqk,bkd->bqd", attn, values)
    attn_out = jnp.squeeze(attn, axis=1) if attn.shape[1] == 1 else attn
    return weighted, attn_out


if __name__ == "__main__":
    B, S_q, S_kv, D = 2, 8, 8, 32
    key = jax.random.PRNGKey(0)
    kx, kq, kp = jax.random.split(key, 3)

    x = jax.random.normal(kx, (B, S_kv, D), jnp.float32)
    q = jax.random.normal(kq, (B, S_q, D), jnp.float32)
    params = init_params(kp, D)

    weighted, attn = attention_forward(x, q, params)
    jax.block_until_ready((weighted, attn))

    # Correctness check against pure-JAX reference.
    # Tolerance relaxed vs. the f64-ish 1e-5 level because the kernel uses the
    # EUP approximate reciprocal for the softmax denominator.
    w_ref, a_ref = attention_reference(x, q, params)
    assert jnp.allclose(weighted, w_ref, atol=2e-3, rtol=2e-3), (
        float(jnp.max(jnp.abs(weighted - w_ref))))
    assert jnp.allclose(attn, a_ref, atol=2e-3, rtol=2e-3), (
        float(jnp.max(jnp.abs(attn - a_ref))))

    print("KERNEL_OK")
</pallas_src>

<mosaic_0001>
module attributes {stable_mosaic.version = 11 : i64} {
  func.func @_attention_kernel(%arg0: i32, %arg1: memref<2x8x32xf32, #tpu.memory_space<vmem>>, %arg2: memref<2x8x32xf32, #tpu.memory_space<vmem>>, %arg3: memref<32x32xf32, #tpu.memory_space<vmem>>, %arg4: memref<1x32xf32, #tpu.memory_space<vmem>>, %arg5: memref<32x32xf32, #tpu.memory_space<vmem>>, %arg6: memref<1x32xf32, #tpu.memory_space<vmem>>, %arg7: memref<32x32xf32, #tpu.memory_space<vmem>>, %arg8: memref<1x32xf32, #tpu.memory_space<vmem>>, %arg9: memref<2x8x32xf32, #tpu.memory_space<vmem>>, %arg10: memref<2x8x8xf32, #tpu.memory_space<vmem>>) attributes {dimension_semantics = [#tpu.dimension_semantics<parallel>], iteration_bounds = array<i64: 1>, scalar_prefetch = 0 : i64, scratch_operands = 0 : i64, tpu.core_type = #tpu.core_type<tc>, window_params = [{transform_indices = @transform_0, window_bounds = array<i64: 2, 8, 32>}, {transform_indices = @transform_1, window_bounds = array<i64: 2, 8, 32>}, {pipeline_mode = #tpu.pipeline_mode<synchronous>, transform_indices = @transform_2, window_bounds = array<i64: 32, 32>}, {pipeline_mode = #tpu.pipeline_mode<synchronous>, transform_indices = @transform_3, window_bounds = array<i64: 1, 32>}, {pipeline_mode = #tpu.pipeline_mode<synchronous>, transform_indices = @transform_4, window_bounds = array<i64: 32, 32>}, {pipeline_mode = #tpu.pipeline_mode<synchronous>, transform_indices = @transform_5, window_bounds = array<i64: 1, 32>}, {pipeline_mode = #tpu.pipeline_mode<synchronous>, transform_indices = @transform_6, window_bounds = array<i64: 32, 32>}, {pipeline_mode = #tpu.pipeline_mode<synchronous>, transform_indices = @transform_7, window_bounds = array<i64: 1, 32>}, {transform_indices = @transform_8, window_bounds = array<i64: 2, 8, 32>}, {transform_indices = @transform_9, window_bounds = array<i64: 2, 8, 8>}]} {
    %c0 = arith.constant 0 : index
    %c0_0 = arith.constant 0 : index
    %c0_1 = arith.constant 0 : index
    %0 = vector.load %arg1[%c0, %c0_0, %c0_1] : memref<2x8x32xf32, #tpu.memory_space<vmem>>, vector<2x8x32xf32>
    %c0_2 = arith.constant 0 : index
    %c0_3 = arith.constant 0 : index
    %c0_4 = arith.constant 0 : index
    %1 = vector.load %arg2[%c0_2, %c0_3, %c0_4] : memref<2x8x32xf32, #tpu.memory_space<vmem>>, vector<2x8x32xf32>
    %2 = vector.shape_cast %0 : vector<2x8x32xf32> to vector<16x32xf32>
    %3 = vector.shape_cast %1 : vector<2x8x32xf32> to vector<16x32xf32>
    %c0_5 = arith.constant 0 : index
    %c0_6 = arith.constant 0 : index
    %4 = vector.load %arg3[%c0_5, %c0_6] : memref<32x32xf32, #tpu.memory_space<vmem>>, vector<32x32xf32>
    %cst = arith.constant dense<0.000000e+00> : vector<16x32xf32>
    %5 = tpu.matmul %2, %4, %cst {dimension_numbers = #tpu.dot_dimension_numbers<[1], [0], [0], [1], [0, 0, 1, 1], [], []>} : vector<16x32xf32>, vector<32x32xf32>, vector<16x32xf32> -> vector<16x32xf32>
    %c0_7 = arith.constant 0 : index
    %c0_8 = arith.constant 0 : index
    %6 = vector.load %arg4[%c0_7, %c0_8] : memref<1x32xf32, #tpu.memory_space<vmem>>, vector<1x32xf32>
    %7 = vector.broadcast %6 : vector<1x32xf32> to vector<16x32xf32>
    %8 = arith.addf %5, %7 : vector<16x32xf32>
    %c0_9 = arith.constant 0 : index
    %c0_10 = arith.constant 0 : index
    %9 = vector.load %arg5[%c0_9, %c0_10] : memref<32x32xf32, #tpu.memory_space<vmem>>, vector<32x32xf32>
    %cst_11 = arith.constant dense<0.000000e+00> : vector<16x32xf32>
    %10 = tpu.matmul %3, %9, %cst_11 {dimension_numbers = #tpu.dot_dimension_numbers<[1], [0], [0], [1], [0, 0, 1, 1], [], []>} : vector<16x32xf32>, vector<32x32xf32>, vector<16x32xf32> -> vector<16x32xf32>
    %c0_12 = arith.constant 0 : index
    %c0_13 = arith.constant 0 : index
    %11 = vector.load %arg6[%c0_12, %c0_13] : memref<1x32xf32, #tpu.memory_space<vmem>>, vector<1x32xf32>
    %12 = vector.broadcast %11 : vector<1x32xf32> to vector<16x32xf32>
    %13 = arith.addf %10, %12 : vector<16x32xf32>
    %c0_14 = arith.constant 0 : index
    %c0_15 = arith.constant 0 : index
    %14 = vector.load %arg7[%c0_14, %c0_15] : memref<32x32xf32, #tpu.memory_space<vmem>>, vector<32x32xf32>
    %cst_16 = arith.constant dense<0.000000e+00> : vector<16x32xf32>
    %15 = tpu.matmul %3, %14, %cst_16 {dimension_numbers = #tpu.dot_dimension_numbers<[1], [0], [0], [1], [0, 0, 1, 1], [], []>} : vector<16x32xf32>, vector<32x32xf32>, vector<16x32xf32> -> vector<16x32xf32>
    %c0_17 = arith.constant 0 : index
    %c0_18 = arith.constant 0 : index
    %16 = vector.load %arg8[%c0_17, %c0_18] : memref<1x32xf32, #tpu.memory_space<vmem>>, vector<1x32xf32>
    %17 = vector.broadcast %16 : vector<1x32xf32> to vector<16x32xf32>
    %18 = arith.addf %15, %17 : vector<16x32xf32>
    %cst_19 = arith.constant 0.176776692 : f32
    %19 = vector.broadcast %cst_19 : f32 to vector<16x32xf32>
    %20 = arith.mulf %8, %19 : vector<16x32xf32>
    %21 = vector.shape_cast %20 : vector<16x32xf32> to vector<2x8x32xf32>
    %22 = vector.shape_cast %13 : vector<16x32xf32> to vector<2x8x32xf32>
    %23 = vector.shape_cast %18 : vector<16x32xf32> to vector<2x8x32xf32>
    "tpu.trace_start"() <{level = 10 : i32, message = "bqd,bkd->bqk"}> : () -> ()
    %cst_20 = arith.constant dense<0.000000e+00> : vector<2x8x8xf32>
    %24 = tpu.matmul %21, %22, %cst_20 {dimension_numbers = #tpu.dot_dimension_numbers<[2], [2], [1], [1], [0, 0, 0, 1, 1, 1], [0], [0]>} : vector<2x8x32xf32>, vector<2x8x32xf32>, vector<2x8x8xf32> -> vector<2x8x8xf32>
    "tpu.trace_stop"() : () -> ()
    %cst_21 = arith.constant dense<0xFF800000> : vector<2x8xf32>
    %25 = vector.multi_reduction <maximumf>, %24, %cst_21 [2] : vector<2x8x8xf32> to vector<2x8xf32>
    %26 = vector.shape_cast %25 : vector<2x8xf32> to vector<2x8x1xf32>
    %27 = vector.broadcast %26 : vector<2x8x1xf32> to vector<2x8x8xf32>
    %28 = arith.subf %24, %27 : vector<2x8x8xf32>
    %29 = math.exp %28 : vector<2x8x8xf32>
    %cst_22 = arith.constant dense<0.000000e+00> : vector<2x8xf32>
    %30 = vector.multi_reduction <add>, %29, %cst_22 [2] : vector<2x8x8xf32> to vector<2x8xf32>
    %31 = vector.shape_cast %30 : vector<2x8xf32> to vector<2x8x1xf32>
    %32 = tpu.reciprocal %31 {approx = true} : vector<2x8x1xf32> -> vector<2x8x1xf32>
    %33 = vector.broadcast %32 : vector<2x8x1xf32> to vector<2x8x8xf32>
    %34 = arith.mulf %29, %33 : vector<2x8x8xf32>
    "tpu.trace_start"() <{level = 10 : i32, message = "bqk,bkd->bqd"}> : () -> ()
    %cst_23 = arith.constant dense<0.000000e+00> : vector<2x8x32xf32>
    %35 = tpu.matmul %34, %23, %cst_23 {dimension_numbers = #tpu.dot_dimension_numbers<[2], [1], [1], [2], [0, 0, 0, 1, 1, 2], [0], [0]>} : vector<2x8x8xf32>, vector<2x8x32xf32>, vector<2x8x32xf32> -> vector<2x8x32xf32>
    "tpu.trace_stop"() : () -> ()
    %c0_24 = arith.constant 0 : index
    %c0_25 = arith.constant 0 : index
    %c0_26 = arith.constant 0 : index
    %36 = vector.load %arg10[%c0_24, %c0_25, %c0_26] : memref<2x8x8xf32, #tpu.memory_space<vmem>>, vector<2x8x8xf32>
    tpu.vector_store %arg10[%c0_24, %c0_25, %c0_26], %34 {strides = array<i32>} : memref<2x8x8xf32, #tpu.memory_space<vmem>>, vector<2x8x8xf32>,
    %c0_27 = arith.constant 0 : index
    %c0_28 = arith.constant 0 : index
    %c0_29 = arith.constant 0 : index
    %37 = vector.load %arg9[%c0_27, %c0_28, %c0_29] : memref<2x8x32xf32, #tpu.memory_space<vmem>>, vector<2x8x32xf32>
    tpu.vector_store %arg9[%c0_27, %c0_28, %c0_29], %35 {strides = array<i32>} : memref<2x8x32xf32, #tpu.memory_space<vmem>>, vector<2x8x32xf32>,
    return
  }
  func.func @transform_0(%arg0: i32) -> (i32, i32, i32) {
    %c0_i32 = arith.constant 0 : i32
    %c0_i32_0 = arith.constant 0 : i32
    %c0_i32_1 = arith.constant 0 : i32
    return %arg0, %c0_i32, %c0_i32_0 : i32, i32, i32
  }
  func.func @transform_1(%arg0: i32) -> (i32, i32, i32) {
    %c0_i32 = arith.constant 0 : i32
    %c0_i32_0 = arith.constant 0 : i32
    %c0_i32_1 = arith.constant 0 : i32
    return %arg0, %c0_i32, %c0_i32_0 : i32, i32, i32
  }
  func.func @transform_2(%arg0: i32) -> (i32, i32) {
    %c0_i32 = arith.constant 0 : i32
    %c0_i32_0 = arith.constant 0 : i32
    %c0_i32_1 = arith.constant 0 : i32
    return %c0_i32, %c0_i32_0 : i32, i32
  }
  func.func @transform_3(%arg0: i32) -> (i32, i32) {
    %c0_i32 = arith.constant 0 : i32
    %c0_i32_0 = arith.constant 0 : i32
    %c0_i32_1 = arith.constant 0 : i32
    return %c0_i32, %c0_i32_0 : i32, i32
  }
  func.func @transform_4(%arg0: i32) -> (i32, i32) {
    %c0_i32 = arith.constant 0 : i32
    %c0_i32_0 = arith.constant 0 : i32
    %c0_i32_1 = arith.constant 0 : i32
    return %c0_i32, %c0_i32_0 : i32, i32
  }
  func.func @transform_5(%arg0: i32) -> (i32, i32) {
    %c0_i32 = arith.constant 0 : i32
    %c0_i32_0 = arith.constant 0 : i32
    %c0_i32_1 = arith.constant 0 : i32
    return %c0_i32, %c0_i32_0 : i32, i32
  }
  func.func @transform_6(%arg0: i32) -> (i32, i32) {
    %c0_i32 = arith.constant 0 : i32
    %c0_i32_0 = arith.constant 0 : i32
    %c0_i32_1 = arith.constant 0 : i32
    return %c0_i32, %c0_i32_0 : i32, i32
  }
  func.func @transform_7(%arg0: i32) -> (i32, i32) {
    %c0_i32 = arith.constant 0 : i32
    %c0_i32_0 = arith.constant 0 : i32
    %c0_i32_1 = arith.constant 0 : i32
    return %c0_i32, %c0_i32_0 : i32, i32
  }
  func.func @transform_8(%arg0: i32) -> (i32, i32, i32) {
    %c0_i32 = arith.constant 0 : i32
    %c0_i32_0 = arith.constant 0 : i32
    %c0_i32_1 = arith.constant 0 : i32
    return %arg0, %c0_i32, %c0_i32_0 : i32, i32, i32
  }
  func.func @transform_9(%arg0: i32) -> (i32, i32, i32) {
    %c0_i32 = arith.constant 0 : i32
    %c0_i32_0 = arith.constant 0 : i32
    %c0_i32_1 = arith.constant 0 : i32
    return %arg0, %c0_i32, %c0_i32_0 : i32, i32, i32
  }
}

</mosaic_0001>

<bundles_post_ra>
// kernel: tpu_custom_call.1
= control target key start
LH: loop header
LB: loop body
LE: loop exit
PB: predicated region body
PF: predicated region fallthrough
CT: control target
= control target key end

     0   :  { %15 = vsyncpa [#allocation3], 0  ;;  %s1252_s0 = inlined_call_operand.hbm [shape: f32[2,8,32], index: 0, kind: input, shape index: {}]   ;;  %s1253_s1 = inlined_call_operand.hbm [shape: f32[2,8,32], index: 1, kind: input, shape index: {}]   ;;  %s1254_s2 = inlined_call_operand.hbm [shape: f32[32,32], index: 2, kind: input, shape index: {}]   ;;  %s1255_s3 = inlined_call_operand.vmem [shape: f32[1,32], index: 3, kind: input, shape index: {}]   ;;  %s1256_s4 = inlined_call_operand.hbm [shape: f32[32,32], index: 4, kind: input, shape index: {}]   ;;  %s1257_s5 = inlined_call_operand.vmem [shape: f32[1,32], index: 5, kind: input, shape index: {}]   ;;  %s1258_s6 = inlined_call_operand.hbm [shape: f32[32,32], index: 6, kind: input, shape index: {}]   ;;  %s1259_s7 = inlined_call_operand.vmem [shape: f32[1,32], index: 7, kind: input, shape index: {}]   ;;  %s1260_s8 = inlined_call_operand.hbm [shape: f32[2,8,32], index: 8, kind: output, shape index: {0}]   ;;  %s1261_s9 = inlined_call_operand.hbm [shape: f32[2,8,8], index: 9, kind: output, shape index: {1}]  }
   0x1   :  { %16 = vsyncpa [#allocation6], 0 }
   0x2   :  { %17 = vsyncpa [#allocation9], 0 }
   0x3   :  { %18 = vsyncpa [#allocation4], 0 }
   0x4   :  { %19 = vsyncpa [#allocation13], 0  ;;  %s1039_s30 = smov [#allocation5]   ;;  %s1040_s11 = smov [#allocation8]  }
   0x5   :  { %s37_s10 = sshll.u32 %s1039_s30, 4  ;;  %s63_s12 = sshll.u32 %s1040_s11, 4  ;;  %s38_s10 = int_to_ptr.vmem [resolvable:$true] %s37_s10  ;;  %s1100_s12 = int_to_ptr.vmem [resolvable:$true] %s63_s12 }
   0x6   :  { %s875_s15 = scalar_lea.hbm %s1253_s1, 256 }
   0x7   :  { %p876_p0 = scmp.ne.s32.totalorder %s1253_s1, %s875_s15  ;;  %p879_p1 = scmp.lt.u32.totalorder %s875_s15, %s1253_s1 }
   0x9   :  { %p881_p2 = pnand %p879_p1, %p876_p0 }
   0xb   :  { %884 = shalt.err (!%p881_p2)
}
   0xc   :  { %s885_s20 = scalar_lea.vmem %s38_s10, 256  ;;  %p890_p4 = scmp.lt.s32.totalorder %s38_s10, %s38_s10 }
   0xd   :  { %p886_p3 = scmp.ne.s32.totalorder %s38_s10, %s885_s20  ;;  %p891_p5 = scmp.lt.s32.totalorder %s885_s20, %s885_s20 }
   0xf   :  { %p892_p6 = por %p891_p5, %p890_p4 }
  0x11   :  { %p893_p7 = pnand %p892_p6, %p886_p3 }
  0x13   :  { %896 = shalt.err (!%p893_p7)
}
  0x14   :  { %s1041_s21 = smov 128   ;;  %s1042_s22 = smov 8  }
  0x15   :  { %43 = dma.hbm_to_vmem [thread:$0]  %s1253_s1, 256, %s38_s10, [#allocation6], %s1041_s21, %s1041_s21, %s1042_s22  }
  0x16   :  { %s897_s27 = scalar_lea.hbm %s1256_s4, 512 }
  0x17   :  { %p898_p8 = scmp.ne.s32.totalorder %s1256_s4, %s897_s27  ;;  %p901_p9 = scmp.lt.u32.totalorder %s897_s27, %s1256_s4 }
  0x19   :  { %p903_p10 = pnand %p901_p9, %p898_p8 }
  0x1b   :  { %906 = shalt.err (!%p903_p10)
}
  0x1c   :  { %s907_s13 = scalar_lea.vmem %s1100_s12, 512  ;;  %p912_p12 = scmp.lt.s32.totalorder %s1100_s12, %s1100_s12 }
  0x1d   :  { %p908_p11 = scmp.ne.s32.totalorder %s1100_s12, %s907_s13  ;;  %p913_p13 = scmp.lt.s32.totalorder %s907_s13, %s907_s13 }
  0x1f   :  { %p914_p0 = por %p913_p13, %p912_p12 }
  0x21   :  { %p915_p1 = pnand %p914_p0, %p908_p11 }
  0x23   :  { %918 = shalt.err (!%p915_p1)
}
  0x24   :  { %69 = dma.hbm_to_vmem [thread:$0]  %s1256_s4, 512, %s1100_s12, [#allocation9], %s1041_s21, %s1041_s21, %s1042_s22  }
  0x25   :  { %s1043_s14 = smov [#allocation2]   ;;  %s1044_s16 = smov [#allocation7]  }
  0x26   :  { %s25_s15 = sshll.u32 %s1043_s14, 4  ;;  %s49_s17 = sshll.u32 %s1044_s16, 4  ;;  %s26_s15 = int_to_ptr.vmem [resolvable:$true] %s25_s15  ;;  %s1137_s17 = int_to_ptr.vmem [resolvable:$true] %s49_s17 }
  0x27   :  { %s919_s20 = scalar_lea.hbm %s1252_s0, 256 }
  0x28   :  { %p920_p2 = scmp.ne.s32.totalorder %s1252_s0, %s919_s20  ;;  %p923_p3 = scmp.lt.u32.totalorder %s919_s20, %s1252_s0 }
  0x2a   :  { %p925_p4 = pnand %p923_p3, %p920_p2 }
  0x2c   :  { %928 = shalt.err (!%p925_p4)
}
  0x2d   :  { %s929_s4 = scalar_lea.vmem %s26_s15, 256  ;;  %p934_p6 = scmp.lt.s32.totalorder %s26_s15, %s26_s15 }
  0x2e   :  { %p930_p5 = scmp.ne.s32.totalorder %s26_s15, %s929_s4  ;;  %p935_p7 = scmp.lt.s32.totalorder %s929_s4, %s929_s4 }
  0x30   :  { %p936_p8 = por %p935_p7, %p934_p6 }
  0x32   :  { %p937_p9 = pnand %p936_p8, %p930_p5 }
  0x34   :  { %940 = shalt.err (!%p937_p9)
}
  0x35   :  { %31 = dma.hbm_to_vmem [thread:$0]  %s1252_s0, 256, %s26_s15, [#allocation3], %s1041_s21, %s1041_s21, %s1042_s22  }
  0x36   :  { %s941_s30 = scalar_lea.hbm %s1254_s2, 512 }
  0x37   :  { %p942_p10 = scmp.ne.s32.totalorder %s1254_s2, %s941_s30  ;;  %p945_p11 = scmp.lt.u32.totalorder %s941_s30, %s1254_s2 }
  0x39   :  { %p947_p12 = pnand %p945_p11, %p942_p10 }
  0x3b   :  { %950 = shalt.err (!%p947_p12)
}
  0x3c   :  { %s951_s14 = scalar_lea.vmem %s1137_s17, 512  ;;  %p956_p0 = scmp.lt.s32.totalorder %s1137_s17, %s1137_s17 }
  0x3d   :  { %p952_p13 = scmp.ne.s32.totalorder %s1137_s17, %s951_s14  ;;  %p957_p1 = scmp.lt.s32.totalorder %s951_s14, %s951_s14 }
  0x3f   :  { %p958_p2 = por %p957_p1, %p956_p0 }
  0x41   :  { %p959_p3 = pnand %p958_p2, %p952_p13 }
  0x43   :  { %962 = shalt.err (!%p959_p3)
}
  0x44   :  { %55 = dma.hbm_to_vmem [thread:$0]  %s1254_s2, 512, %s1137_s17, [#allocation6], %s1041_s21, %s1041_s21, %s1042_s22  }
  0x45   :  { %s1045_s16 = smov [#allocation10]   ;;  %s963_s23 = scalar_lea.hbm %s1258_s6, 512 }
  0x46   :  { %s77_s18 = sshll.u32 %s1045_s16, 4  ;;  %p964_p4 = scmp.ne.s32.totalorder %s1258_s6, %s963_s23  ;;  %s78_s18 = int_to_ptr.vmem [resolvable:$true] %s77_s18 }
  0x47   :  { %p967_p5 = scmp.lt.u32.totalorder %s963_s23, %s1258_s6 }
  0x49   :  { %p969_p6 = pnand %p967_p5, %p964_p4 }
  0x4b   :  { %972 = shalt.err (!%p969_p6)
}
  0x4c   :  { %s973_s12 = scalar_lea.vmem %s78_s18, 512  ;;  %p978_p8 = scmp.lt.s32.totalorder %s78_s18, %s78_s18 }
  0x4d   :  { %p974_p7 = scmp.ne.s32.totalorder %s78_s18, %s973_s12  ;;  %p979_p9 = scmp.lt.s32.totalorder %s973_s12, %s973_s12 }
  0x4f   :  { %p980_p10 = por %p979_p9, %p978_p8 }
  0x51   :  { %p981_p11 = pnand %p980_p10, %p974_p7 }
  0x53   :  { %984 = shalt.err (!%p981_p11)
}
  0x54   :  { %83 = dma.hbm_to_vmem [thread:$0]  %s1258_s6, 512, %s78_s18, [#allocation9], %s1041_s21, %s1041_s21, %s1042_s22  }
  0x55   :  { %1029 = dma.done.wait [#allocation3], 256  }
  0x56   :  { %1030 = vsyncadd [#allocation3], 4294967040 }
  0x57   :  { %1031 = dma.done.wait [#allocation6], 768  }
  0x58   :  { %1032 = vsyncadd [#allocation6], 4294966528 }
  0x59   :  { %1033 = dma.done.wait [#allocation9], 1024  }
  0x5a   :  { %1034 = vsyncadd [#allocation9], 4294966272  ;;  %v198_v0 = vld [vmem:[#allocation8] sm:$0xff]  ;;  %v199_v1 = vld [vmem:[#allocation8 + $0x8] sm:$0xff]  ;;  %vm116_vm0 = vcmask 261120   ;;  %v1046_v16 = vmov 0.0  }
  0x5b   :  { %v105_v2 = vld [vmem:[#allocation7] sm:$0xff]  ;;  %v840_v3 = vpack.c.bf16 %v199_v1, %v198_v0  ;;  %v106_v4 = vld [vmem:[#allocation7 + $0x8] sm:$0xff]  ;;  %v200_v5 = vld [vmem:[#allocation8 + $0x10] sm:$0xff]  ;;  %vm1047_vm1 = vmmov 0   ;;  %vm530_vm2 = vcmask 64512  }
  0x5c   :  { %v201_v6 = vld [vmem:[#allocation8 + $0x18] sm:$0xff]  ;;  %v832_v7 = vpack.c.bf16 %v106_v4, %v105_v2  ;;  %v107_v9 = vld [vmem:[#allocation7 + $0x10] sm:$0xff]  ;;  %v101_v13 = vld [vmem:[#allocation2] sm:$0xff] }
  0x5d   :  { %v844_v8 = vpack.c.bf16 %v201_v6, %v200_v5  ;;  %v108_v10 = vld [vmem:[#allocation7 + $0x18] sm:$0xff]  ;;  %v103_v11 = vld [vmem:[#allocation5] sm:$0xff]  ;;  %841 = vmatprep.subr.bf16.mxu1 %v840_v3  ;;  %787 = vmatprep.mubr.msk.f32.mxu0 %vm116_vm0, %v101_v13  ;;  %v102_v15 = vld [vmem:[#allocation2 + $0x8] sm:$0xff] }
  0x5e   :  { %v836_v12 = vpack.c.bf16 %v108_v10, %v107_v9  ;;  %798 = vmatprep.mubr.msk.f32.mxu1 %vm116_vm0, %v103_v11  ;;  %833 = vmatprep.subr.bf16.mxu0 %v832_v7  ;;  %v104_v14 = vld [vmem:[#allocation5 + $0x8] sm:$0xff]  ;;  %v741_v17 = vld [vmem:[%s1257_s5] ss:$0 sm:$0xff]  ;;  %v291_v30 = vld [vmem:[#allocation10 + $0x8] sm:$0xff] }
  0x5f   :  { %843 = vmatpush3.bf16.msra.mxu1 %v840_v3  ;;  %835 = vmatpush3.bf16.msra.mxu0 %v832_v7  ;;  %v738_v19 = vld [vmem:[%s1255_s3] ss:$0 sm:$0xff]  ;;  %v292_v31 = vld [vmem:[#allocation10 + $0x10] sm:$0xff]  ;;  %v293_v33 = vld [vmem:[#allocation10 + $0x18] sm:$0xff] }
  0x60   :  { %845 = vmatprep.subr.bf16.mxu1 %v844_v8  ;;  %837 = vmatprep.subr.bf16.mxu0 %v836_v12  ;;  %v290_v29 = vld [vmem:[#allocation10] sm:$0xff]  ;;  %v852_v34 = vpack.c.bf16 %v293_v33, %v292_v31 }
  0x61   :  { %v848_v32 = vpack.c.bf16 %v291_v30, %v290_v29  ;;  %v744_v52 = vld [vmem:[%s1259_s7] ss:$0 sm:$0xff]  ;;  %s1048_s7 = smov [#allocation12]  }
  0x62   :  { %s720_s30 = sshll.u32 %s1048_s7, 4  ;;  %s721_s30 = int_to_ptr.vmem [resolvable:$true] %s720_s30 }
  0x63   :  { %847 = vmatpush3.bf16.msra.mxu1 %v844_v8  ;;  %839 = vmatpush3.bf16.msra.mxu0 %v836_v12  ;;  %s985_s11 = scalar_lea.vmem %s721_s30, 256  ;;  %p990_p13 = scmp.lt.s32.totalorder %s721_s30, %s721_s30 }
  0x64   :  { %812 = vmatprep.subr.mxu1 %v1046_v16  ;;  %849 = vmatprep.subr.bf16.mxu0 %v848_v32  ;;  %p986_p12 = scmp.ne.s32.totalorder %s721_s30, %s985_s11  ;;  %p991_p0 = scmp.lt.s32.totalorder %s985_s11, %s985_s11 }
  0x66   :  { %799 = vmatmul.mubr.msk.f32.vlgmr.msra.gmra.mrb[0].mxu1 %vm116_vm0, %v104_v14  ;;  %788 = vmatmul.mubr.msk.f32.vlgmr.msra.gmra.mrb[0].mxu0 %vm116_vm0, %v102_v15  ;;  %p992_p1 = por %p991_p0, %p990_p13 }
  0x67   :  { %809 = vmatprep.mubr.msk.f32.mxu0 %vm116_vm0, %v103_v11  ;;  %814 = vmatprep.mubr.msk.f32.mxu1 %vm1047_vm1, %v1046_v16 }
  0x68   :  { %851 = vmatpush3.bf16.msra.mxu0 %v848_v32  ;;  %p993_p2 = pnand %p992_p1, %p986_p12 }
  0x69   :  { %853 = vmatprep.subr.bf16.mxu0 %v852_v34 }
  0x6c   :  { %855 = vmatpush3.bf16.msra.mxu0 %v852_v34 }
  0x6d   :  { %822 = vmatprep.subr.mxu0 %v1046_v16 }
  0x6f   :  { %810 = vmatmul.mubr.msk.f32.vlgmr.msra.gmra.mrb[2].mxu0 %vm116_vm0, %v104_v14 }
  0x70   :  { %824 = vmatprep.mubr.msk.f32.mxu0 %vm1047_vm1, %v1046_v16 }
 0x139   :  { %v800_v18 = vpop.f32.mrb[0].mxu1  ;;  %v789_v20 = vpop.f32.mrb[0].mxu0 }
 0x13a   :  { %v281_v21 = vpop.f32.mrb[1].mxu1  ;;  %v189_v23 = vpop.f32.mrb[1].mxu0  ;;  %v195_v25 = vadd.f32 %v789_v20, %v738_v19  ;;  %v287_v27 = vadd.f32 %v800_v18, %v741_v17 }
 0x13b   :  { %v282_v22 = vadd.f32 %v741_v17, %v281_v21  ;;  %v190_v24 = vadd.f32 %v738_v19, %v189_v23 }
 0x13c   :  { %v377_v28 = vmul.f32 0.17677669, %v195_v25 }
 0x13d   :  { %813 = vmatpush3.xpose.msk.msra.mxu1 %vm116_vm0, %v282_v22  ;;  %v376_v26 = vmul.f32 0.17677669, %v190_v24 }
 0x13e   :  { %817 = vmatprep.subr.mxu1 %v1046_v16 }
 0x140   :  { %815 = vmatmul.mubr.msk.f32.vlgmr.msra.gmra.mrb[2].mxu1 %vm116_vm0, %v376_v26 }
 0x141   :  { %818 = vmatpush3.xpose.msk.msra.mxu1 %vm116_vm0, %v287_v27  ;;  %819 = vmatprep.mubr.msk.f32.mxu1 %vm1047_vm1, %v1046_v16 }
 0x142   :  { %827 = vmatprep.subr.mxu1 %v1046_v16  ;;  %v811_v51 = vpop.f32.mrb[2].mxu0 }
 0x143   :  { %v367_v53 = vpop.f32.mrb[3].mxu0  ;;  %v373_v55 = vadd.f32 %v811_v51, %v744_v52 }
 0x144   :  { %820 = vmatmul.mubr.msk.f32.vlgmr.msra.gmra.mrb[4].mxu1 %vm116_vm0, %v377_v28  ;;  %v368_v54 = vadd.f32 %v744_v52, %v367_v53 }
 0x145   :  { %829 = vmatprep.mubr.msk.f32.mxu1 %vm1047_vm1, %v1046_v16  ;;  %828 = vmatpush3.msra.mxu1 %v373_v55 }
 0x146   :  { %823 = vmatpush3.msra.mxu0 %v368_v54 }
 0x213   :  { %v450_v35 = vpop.f32.mrb[2].mxu1 }
 0x214   :  { %v816_v36 = vpop.f32.mrb[3].mxu1  ;;  %v531_v37 = vsel %vm530_vm2, %v450_v35, -inf }
 0x215   :  { %532 = vmax.xlane.f32.xlu0 %v531_v37 }
 0x217   :  { %v526_v38 = vpop.f32.mrb[4].mxu1 }
 0x218   :  { %v821_v39 = vpop.f32.mrb[5].mxu1  ;;  %v534_v40 = vsel %vm530_vm2, %v526_v38, -inf }
 0x219   :  { %535 = vmax.xlane.f32.xlu0 %v534_v40 }
 0x2a2   :  { %v533_v41 = vpop.xlane.xlu0 %532 }
 0x2a3   :  { %v537_v42 = vsub.f32 %v450_v35, %v533_v41 }
 0x2a5   :  { %v539_v43 = vmul.f32 1.442695, %v537_v42 }
 0x2a6   :  { %v536_v44 = vpop.xlane.xlu0 %535 }
 0x2a7   :  { %867 = vpow2.f32 %v539_v43  ;;  %v538_v45 = vsub.f32 %v526_v38, %v536_v44 }
 0x2a9   :  { %v541_v46 = vmul.f32 1.442695, %v538_v45 }
 0x2ab   :  { %869 = vpow2.f32 %v541_v46 }
 0x2b1   :  { %v868_v47 = vpop.eup %867 }
 0x2b2   :  { %v543_v48 = vsel %vm530_vm2, %v868_v47, 0.0 }
 0x2b3   :  { %544 = vadd.xlane.f32.xlu1 %v543_v48 }
 0x2b5   :  { %v870_v49 = vpop.eup %869 }
 0x2b6   :  { %v546_v50 = vsel %vm530_vm2, %v870_v49, 0.0 }
 0x2b7   :  { %547 = vadd.xlane.f32.xlu1 %v546_v50 }
 0x340   :  { %v545_v56 = vpop.xlane.xlu1 %544 }
 0x341   :  { %871 = vrcp.f32 %v545_v56 }
 0x344   :  { %v548_v57 = vpop.xlane.xlu1 %547 }
 0x345   :  { %873 = vrcp.f32 %v548_v57 }
 0x34b   :  { %v872_v58 = vpop.eup %871 }
 0x34c   :  { %v551_v59 = vmul.f32 %v872_v58, %v868_v47 }
 0x34e   :  { %699 = vst.msk [vmem:[#allocation12] sm:$0xff] %vm530_vm2, %v551_v59  ;;  %825 = vmatmul.mubr.msk.f32.vlgmr.msra.gmra.mrb[4].mxu0 %vm530_vm2, %v551_v59 }
 0x34f   :  { %v874_v60 = vpop.eup %873 }
 0x350   :  { %v552_v61 = vmul.f32 %v874_v60, %v870_v49 }
 0x352   :  { %700 = vst.msk [vmem:[#allocation12 + $0x8] sm:$0xff] %vm530_vm2, %v552_v61  ;;  %830 = vmatmul.mubr.msk.f32.vlgmr.msra.gmra.mrb[6].mxu1 %vm530_vm2, %v552_v61 }
 0x353   :  { %996 = shalt.err (!%p993_p2)
}
 0x354   :  { %s997_s10 = scalar_lea.hbm %s1261_s9, 256 }
 0x355   :  { %p998_p3 = scmp.ne.s32.totalorder %s1261_s9, %s997_s10  ;;  %p1001_p4 = scmp.lt.u32.totalorder %s997_s10, %s1261_s9 }
 0x357   :  { %p1003_p5 = pnand %p1001_p4, %p998_p3 }
 0x359   :  { %1006 = shalt.err (!%p1003_p5)
}
 0x35a   :  { %726 = dma.vmem_to_hbm [thread:$0]  %s721_s30, 256, %s1261_s9, [#allocation13], %s1041_s21, %s1041_s21, %s1042_s22  }
 0x35b   :  { %s1049_s20 = smov [#allocation11]  }
 0x35c   :  { %s708_s23 = sshll.u32 %s1049_s20, 4  ;;  %s709_s23 = int_to_ptr.vmem [resolvable:$true] %s708_s23 }
 0x35d   :  { %s1007_s24 = scalar_lea.vmem %s709_s23, 256  ;;  %p1012_p7 = scmp.lt.s32.totalorder %s709_s23, %s709_s23 }
 0x35e   :  { %p1008_p6 = scmp.ne.s32.totalorder %s709_s23, %s1007_s24  ;;  %p1013_p8 = scmp.lt.s32.totalorder %s1007_s24, %s1007_s24 }
 0x360   :  { %p1014_p9 = por %p1013_p8, %p1012_p7 }
 0x362   :  { %p1015_p10 = pnand %p1014_p9, %p1008_p6 }
 0x421   :  { %v622_v62 = vpop.f32.mrb[4].mxu0 }
 0x422   :  { %701 = vst.msk [vmem:[#allocation11] sm:$0xff] %vm116_vm0, %v622_v62  ;;  %v826_v63 = vpop.f32.mrb[5].mxu0 }
 0x425   :  { %v695_v0 = vpop.f32.mrb[6].mxu1 }
 0x426   :  { %702 = vst.msk [vmem:[#allocation11 + $0x8] sm:$0xff] %vm116_vm0, %v695_v0  ;;  %v831_v1 = vpop.f32.mrb[7].mxu1 }
 0x427   :  { %1018 = shalt.err (!%p1015_p10)
}
 0x428   :  { %s1019_s26 = scalar_lea.hbm %s1260_s8, 256 }
 0x429   :  { %p1020_p11 = scmp.ne.s32.totalorder %s1260_s8, %s1019_s26  ;;  %p1023_p12 = scmp.lt.u32.totalorder %s1019_s26, %s1260_s8 }
 0x42b   :  { %p1025_p13 = pnand %p1023_p12, %p1020_p11 }
 0x42d   :  { %1028 = shalt.err (!%p1025_p13)
}
 0x42e   :  { %714 = dma.vmem_to_hbm [thread:$0]  %s709_s23, 256, %s1260_s8, [#allocation4], %s1041_s21, %s1041_s21, %s1042_s22  }
 0x42f   :  { %1035 = dma.done.wait [#allocation4], 256  }
 0x430   :  { %1036 = vsyncadd [#allocation4], 4294967040 }
 0x431   :  { %1037 = dma.done.wait [#allocation13], 256  }
 0x432   :  { %1038 = vsyncadd [#allocation13], 4294967040 }
 0x433   :  { %733 = vsyncpa [#allocation3], 1 }
 0x434   :  { %734 = vsyncpa [#allocation6], 1 }
 0x435   :  { %735 = vsyncpa [#allocation9], 1 }
 0x436   :  { %736 = vsyncpa [#allocation4], 1 }
 0x437   :  { %737 = vsyncpa [#allocation13], 1 }

</bundles_post_ra>
